<compile_context>
chip_gen: v7x
topology: tpu7x:2x2x1
jax: 0.10.0
libtpu: 0.0.40
codegen_flags: <defaults>
</compile_context>

<pallas_src>
import functools

import jax
import jax.numpy as jnp
from jax.experimental import pallas as pl
from jax.experimental.pallas import tpu as pltpu


def _conv1x1_bn_relu_kernel(w_ref, shift_ref, rgb_ref, t_ref, o_ref):
    """relu(sum_c w[co,c]*x[c] + shift[co]) over a lane-dense (TS, LANE) pixel tile.

    w_ref:     SMEM (Cout, Cin)   -- conv weight with BN scale folded in
    shift_ref: SMEM (Cout,)       -- BN shift (beta - mean*scale)
    rgb_ref:   VMEM (1, Crgb, TS, LANE)
    t_ref:     VMEM (1, Ct,   TS, LANE)
    o_ref:     VMEM (1, Cout, TS, LANE)
    """
    crgb = rgb_ref.shape[1]
    ct = t_ref.shape[1]
    cout = o_ref.shape[1]
    tile_shape = (o_ref.shape[2], o_ref.shape[3])

    for co in range(cout):                      # static unroll (Cout is tiny)
        acc = jnp.full(tile_shape, shift_ref[co], dtype=jnp.float32)
        for c in range(crgb):                   # broadcast-scalar FMAs on the VPU
            acc = acc + w_ref[co, c] * rgb_ref[0, c]
        for c in range(ct):
            acc = acc + w_ref[co, crgb + c] * t_ref[0, c]
        o_ref[0, co] = jnp.maximum(acc, 0.0).astype(o_ref.dtype)


def _choose_tiles(hw):
    """Pick (padded pixel count, lane width, total sublanes, sublane tile)."""
    lane = None
    for cand in (1024, 512, 256, 128):
        if hw % cand == 0:
            lane, hwp = cand, hw
            break
    if lane is None:
        # Fallback: pad the flattened pixel axis to a multiple of 8*128 so the
        # sublane extent stays a multiple of 8 (costs one extra input pass).
        lane = 128
        hwp = -(-hw // 1024) * 1024
    s_total = hwp // lane
    # ~64K pixels (~2.5 MiB of f32 input) per grid step amortizes step overhead.
    target = max(1, (64 * 1024) // lane)
    if s_total <= target:
        ts = s_total
    else:
        ts = s_total  # full-dim fallback keeps the BlockSpec legal
        for d in range(target - target % 8, 0, -8):
            if s_total % d == 0:
                ts = d
                break
    return hwp, lane, s_total, ts


@functools.partial(jax.jit, static_argnames=("eps",))
def base_ppm_forward(rgb, t, conv_w, bn_gamma, bn_beta, bn_mean, bn_var, eps=1e-5):
    """rgb: (N, Crgb, H, W), t: (N, Ct, H, W) -> (N, Cout, H+2, W+2) in NCHW."""
    N, crgb, H, W = rgb.shape
    ct = t.shape[1]
    cin = crgb + ct
    cout = conv_w.shape[0]
    hw = H * W

    # Fold eval-mode BN into the conv weight and a per-channel shift.
    scale = bn_gamma * jax.lax.rsqrt(bn_var + eps)                 # (Cout,)
    w = (conv_w.reshape(cout, cin) * scale[:, None]).astype(jnp.float32)
    shift = (bn_beta - bn_mean * scale).astype(jnp.float32)        # (Cout,)

    hwp, lane, s_total, ts = _choose_tiles(hw)

    rgb2 = rgb.reshape(N, crgb, hw)                                # free reshapes (NCHW contiguous)
    t2 = t.reshape(N, ct, hw)
    if hwp != hw:
        rgb2 = jnp.pad(rgb2, ((0, 0), (0, 0), (0, hwp - hw)))
        t2 = jnp.pad(t2, ((0, 0), (0, 0), (0, hwp - hw)))
    rgb4 = rgb2.reshape(N, crgb, s_total, lane)
    t4 = t2.reshape(N, ct, s_total, lane)

    grid = (N, s_total // ts)

    interior = pl.pallas_call(
        _conv1x1_bn_relu_kernel,
        out_shape=jax.ShapeDtypeStruct((N, cout, s_total, lane), rgb.dtype),
        grid_spec=pltpu.PrefetchScalarGridSpec(
            num_scalar_prefetch=2,          # w, shift -> SMEM
            grid=grid,
            in_specs=[
                pl.BlockSpec((1, crgb, ts, lane), lambda n, j, w_r, s_r: (n, 0, j, 0)),
                pl.BlockSpec((1, ct, ts, lane), lambda n, j, w_r, s_r: (n, 0, j, 0)),
            ],
            out_specs=pl.BlockSpec((1, cout, ts, lane), lambda n, j, w_r, s_r: (n, 0, j, 0)),
        ),
        compiler_params=pltpu.CompilerParams(
            dimension_semantics=("parallel", "parallel")),
    )(w, shift, rgb4, t4)

    interior = interior.reshape(N, cout, hwp)[:, :, :hw].reshape(N, cout, H, W)

    # Conv padding=1 border: conv(0) -> BN -> ReLU == relu(shift) per channel.
    border = jnp.maximum(shift, 0.0).astype(rgb.dtype)
    out = jnp.broadcast_to(border[None, :, None, None], (N, cout, H + 2, W + 2))
    out = out.at[:, :, 1:-1, 1:-1].set(interior)
    return out


if __name__ == "__main__":
    # Module config: RGB_in_channels=4, T_in_channels=4 -> Cin=8,
    # conv out channels = RGB_in_channels // 2 = 2, out_channels(BN) = 2.
    RGB_in, T_in, out_ch = 4, 4, 2
    N, H, W = 2, 16, 16

    key = jax.random.PRNGKey(0)
    k_rgb, k_t, k_w, k_g, k_b, k_m, k_v = jax.random.split(key, 7)

    rgb = jax.random.normal(k_rgb, (N, RGB_in, H, W), dtype=jnp.float32)
    t = jax.random.normal(k_t, (N, T_in, H, W), dtype=jnp.float32)

    # Deterministic synthetic parameters (shapes as in the PyTorch module).
    conv_w = jax.random.normal(k_w, (out_ch, RGB_in + T_in, 1, 1), dtype=jnp.float32) * 0.1
    bn_gamma = 1.0 + 0.1 * jax.random.normal(k_g, (out_ch,), dtype=jnp.float32)
    bn_beta = 0.1 * jax.random.normal(k_b, (out_ch,), dtype=jnp.float32)
    bn_mean = 0.1 * jax.random.normal(k_m, (out_ch,), dtype=jnp.float32)
    bn_var = jax.random.uniform(k_v, (out_ch,), dtype=jnp.float32, minval=0.5, maxval=1.5)

    out = base_ppm_forward(rgb, t, conv_w, bn_gamma, bn_beta, bn_mean, bn_var)
    jax.block_until_ready(out)

    # Pure-JAX reference check (same math, no Pallas).
    x = jnp.concatenate([rgb, t], axis=1)
    xp = jnp.pad(x, ((0, 0), (0, 0), (1, 1), (1, 1)))
    conv = jnp.einsum("nchw,oc->nohw", xp, conv_w.reshape(out_ch, RGB_in + T_in))
    sc = (bn_gamma / jnp.sqrt(bn_var + 1e-5)).reshape(1, out_ch, 1, 1)
    sh = (bn_beta - bn_mean * bn_gamma / jnp.sqrt(bn_var + 1e-5)).reshape(1, out_ch, 1, 1)
    ref = jnp.maximum(conv * sc + sh, 0.0)

    assert out.shape == (N, out_ch, H + 2, W + 2), out.shape
    assert jnp.allclose(out, ref, atol=1e-5, rtol=1e-5), float(jnp.max(jnp.abs(out - ref)))

    print("KERNEL_OK")
</pallas_src>

<mosaic_0001>
module attributes {stable_mosaic.version = 11 : i64} {
  func.func @_conv1x1_bn_relu_kernel(%arg0: i32, %arg1: i32, %arg2: memref<2x8xf32, #tpu.memory_space<smem>>, %arg3: memref<2xf32, #tpu.memory_space<smem>>, %arg4: memref<1x4x1x256xf32, #tpu.memory_space<vmem>>, %arg5: memref<1x4x1x256xf32, #tpu.memory_space<vmem>>, %arg6: memref<1x2x1x256xf32, #tpu.memory_space<vmem>>) attributes {dimension_semantics = [#tpu.dimension_semantics<parallel>, #tpu.dimension_semantics<parallel>], iteration_bounds = array<i64: 2, 1>, scalar_prefetch = 2 : i64, scratch_operands = 0 : i64, tpu.core_type = #tpu.core_type<tc>, window_params = [{transform_indices = @transform_0, window_bounds = array<i64: 1, 4, 1, 256>}, {transform_indices = @transform_1, window_bounds = array<i64: 1, 4, 1, 256>}, {transform_indices = @transform_2, window_bounds = array<i64: 1, 2, 1, 256>}]} {
    %c0 = arith.constant 0 : index
    %0 = memref.load %arg3[%c0] : memref<2xf32, #tpu.memory_space<smem>>
    %1 = vector.broadcast %0 : f32 to vector<1x256xf32>
    %c0_0 = arith.constant 0 : index
    %c0_1 = arith.constant 0 : index
    %2 = memref.load %arg2[%c0_0, %c0_1] : memref<2x8xf32, #tpu.memory_space<smem>>
    %c0_2 = arith.constant 0 : index
    %c0_3 = arith.constant 0 : index
    %c0_4 = arith.constant 0 : index
    %c0_5 = arith.constant 0 : index
    %3 = vector.load %arg4[%c0_2, %c0_3, %c0_4, %c0_5] : memref<1x4x1x256xf32, #tpu.memory_space<vmem>>, vector<1x1x1x256xf32>
    %4 = vector.shape_cast %3 : vector<1x1x1x256xf32> to vector<1x256xf32>
    %5 = vector.broadcast %2 : f32 to vector<1x256xf32>
    %6 = arith.mulf %5, %4 : vector<1x256xf32>
    %7 = arith.addf %1, %6 : vector<1x256xf32>
    %c0_6 = arith.constant 0 : index
    %c1 = arith.constant 1 : index
    %8 = memref.load %arg2[%c0_6, %c1] : memref<2x8xf32, #tpu.memory_space<smem>>
    %c0_7 = arith.constant 0 : index
    %c1_8 = arith.constant 1 : index
    %c0_9 = arith.constant 0 : index
    %c0_10 = arith.constant 0 : index
    %9 = vector.load %arg4[%c0_7, %c1_8, %c0_9, %c0_10] : memref<1x4x1x256xf32, #tpu.memory_space<vmem>>, vector<1x1x1x256xf32>
    %10 = vector.shape_cast %9 : vector<1x1x1x256xf32> to vector<1x256xf32>
    %11 = vector.broadcast %8 : f32 to vector<1x256xf32>
    %12 = arith.mulf %11, %10 : vector<1x256xf32>
    %13 = arith.addf %7, %12 : vector<1x256xf32>
    %c0_11 = arith.constant 0 : index
    %c2 = arith.constant 2 : index
    %14 = memref.load %arg2[%c0_11, %c2] : memref<2x8xf32, #tpu.memory_space<smem>>
    %c0_12 = arith.constant 0 : index
    %c2_13 = arith.constant 2 : index
    %c0_14 = arith.constant 0 : index
    %c0_15 = arith.constant 0 : index
    %15 = vector.load %arg4[%c0_12, %c2_13, %c0_14, %c0_15] : memref<1x4x1x256xf32, #tpu.memory_space<vmem>>, vector<1x1x1x256xf32>
    %16 = vector.shape_cast %15 : vector<1x1x1x256xf32> to vector<1x256xf32>
    %17 = vector.broadcast %14 : f32 to vector<1x256xf32>
    %18 = arith.mulf %17, %16 : vector<1x256xf32>
    %19 = arith.addf %13, %18 : vector<1x256xf32>
    %c0_16 = arith.constant 0 : index
    %c3 = arith.constant 3 : index
    %20 = memref.load %arg2[%c0_16, %c3] : memref<2x8xf32, #tpu.memory_space<smem>>
    %c0_17 = arith.constant 0 : index
    %c3_18 = arith.constant 3 : index
    %c0_19 = arith.constant 0 : index
    %c0_20 = arith.constant 0 : index
    %21 = vector.load %arg4[%c0_17, %c3_18, %c0_19, %c0_20] : memref<1x4x1x256xf32, #tpu.memory_space<vmem>>, vector<1x1x1x256xf32>
    %22 = vector.shape_cast %21 : vector<1x1x1x256xf32> to vector<1x256xf32>
    %23 = vector.broadcast %20 : f32 to vector<1x256xf32>
    %24 = arith.mulf %23, %22 : vector<1x256xf32>
    %25 = arith.addf %19, %24 : vector<1x256xf32>
    %c0_21 = arith.constant 0 : index
    %c4 = arith.constant 4 : index
    %26 = memref.load %arg2[%c0_21, %c4] : memref<2x8xf32, #tpu.memory_space<smem>>
    %c0_22 = arith.constant 0 : index
    %c0_23 = arith.constant 0 : index
    %c0_24 = arith.constant 0 : index
    %c0_25 = arith.constant 0 : index
    %27 = vector.load %arg5[%c0_22, %c0_23, %c0_24, %c0_25] : memref<1x4x1x256xf32, #tpu.memory_space<vmem>>, vector<1x1x1x256xf32>
    %28 = vector.shape_cast %27 : vector<1x1x1x256xf32> to vector<1x256xf32>
    %29 = vector.broadcast %26 : f32 to vector<1x256xf32>
    %30 = arith.mulf %29, %28 : vector<1x256xf32>
    %31 = arith.addf %25, %30 : vector<1x256xf32>
    %c0_26 = arith.constant 0 : index
    %c5 = arith.constant 5 : index
    %32 = memref.load %arg2[%c0_26, %c5] : memref<2x8xf32, #tpu.memory_space<smem>>
    %c0_27 = arith.constant 0 : index
    %c1_28 = arith.constant 1 : index
    %c0_29 = arith.constant 0 : index
    %c0_30 = arith.constant 0 : index
    %33 = vector.load %arg5[%c0_27, %c1_28, %c0_29, %c0_30] : memref<1x4x1x256xf32, #tpu.memory_space<vmem>>, vector<1x1x1x256xf32>
    %34 = vector.shape_cast %33 : vector<1x1x1x256xf32> to vector<1x256xf32>
    %35 = vector.broadcast %32 : f32 to vector<1x256xf32>
    %36 = arith.mulf %35, %34 : vector<1x256xf32>
    %37 = arith.addf %31, %36 : vector<1x256xf32>
    %c0_31 = arith.constant 0 : index
    %c6 = arith.constant 6 : index
    %38 = memref.load %arg2[%c0_31, %c6] : memref<2x8xf32, #tpu.memory_space<smem>>
    %c0_32 = arith.constant 0 : index
    %c2_33 = arith.constant 2 : index
    %c0_34 = arith.constant 0 : index
    %c0_35 = arith.constant 0 : index
    %39 = vector.load %arg5[%c0_32, %c2_33, %c0_34, %c0_35] : memref<1x4x1x256xf32, #tpu.memory_space<vmem>>, vector<1x1x1x256xf32>
    %40 = vector.shape_cast %39 : vector<1x1x1x256xf32> to vector<1x256xf32>
    %41 = vector.broadcast %38 : f32 to vector<1x256xf32>
    %42 = arith.mulf %41, %40 : vector<1x256xf32>
    %43 = arith.addf %37, %42 : vector<1x256xf32>
    %c0_36 = arith.constant 0 : index
    %c7 = arith.constant 7 : index
    %44 = memref.load %arg2[%c0_36, %c7] : memref<2x8xf32, #tpu.memory_space<smem>>
    %c0_37 = arith.constant 0 : index
    %c3_38 = arith.constant 3 : index
    %c0_39 = arith.constant 0 : index
    %c0_40 = arith.constant 0 : index
    %45 = vector.load %arg5[%c0_37, %c3_38, %c0_39, %c0_40] : memref<1x4x1x256xf32, #tpu.memory_space<vmem>>, vector<1x1x1x256xf32>
    %46 = vector.shape_cast %45 : vector<1x1x1x256xf32> to vector<1x256xf32>
    %47 = vector.broadcast %44 : f32 to vector<1x256xf32>
    %48 = arith.mulf %47, %46 : vector<1x256xf32>
    %49 = arith.addf %43, %48 : vector<1x256xf32>
    %cst = arith.constant 0.000000e+00 : f32
    %50 = vector.broadcast %cst : f32 to vector<1x256xf32>
    %51 = arith.maximumf %49, %50 : vector<1x256xf32>
    %c0_41 = arith.constant 0 : index
    %c0_42 = arith.constant 0 : index
    %c0_43 = arith.constant 0 : index
    %c0_44 = arith.constant 0 : index
    %52 = vector.load %arg6[%c0_41, %c0_42, %c0_43, %c0_44] : memref<1x2x1x256xf32, #tpu.memory_space<vmem>>, vector<1x1x1x256xf32>
    %53 = vector.shape_cast %52 : vector<1x1x1x256xf32> to vector<1x256xf32>
    %54 = vector.shape_cast %51 : vector<1x256xf32> to vector<1x1x1x256xf32>
    tpu.vector_store %arg6[%c0_41, %c0_42, %c0_43, %c0_44], %54 {strides = array<i32>} : memref<1x2x1x256xf32, #tpu.memory_space<vmem>>, vector<1x1x1x256xf32>,
    %c1_45 = arith.constant 1 : index
    %55 = memref.load %arg3[%c1_45] : memref<2xf32, #tpu.memory_space<smem>>
    %56 = vector.broadcast %55 : f32 to vector<1x256xf32>
    %c1_46 = arith.constant 1 : index
    %c0_47 = arith.constant 0 : index
    %57 = memref.load %arg2[%c1_46, %c0_47] : memref<2x8xf32, #tpu.memory_space<smem>>
    %c0_48 = arith.constant 0 : index
    %c0_49 = arith.constant 0 : index
    %c0_50 = arith.constant 0 : index
    %c0_51 = arith.constant 0 : index
    %58 = vector.load %arg4[%c0_48, %c0_49, %c0_50, %c0_51] : memref<1x4x1x256xf32, #tpu.memory_space<vmem>>, vector<1x1x1x256xf32>
    %59 = vector.shape_cast %58 : vector<1x1x1x256xf32> to vector<1x256xf32>
    %60 = vector.broadcast %57 : f32 to vector<1x256xf32>
    %61 = arith.mulf %60, %59 : vector<1x256xf32>
    %62 = arith.addf %56, %61 : vector<1x256xf32>
    %c1_52 = arith.constant 1 : index
    %c1_53 = arith.constant 1 : index
    %63 = memref.load %arg2[%c1_52, %c1_53] : memref<2x8xf32, #tpu.memory_space<smem>>
    %c0_54 = arith.constant 0 : index
    %c1_55 = arith.constant 1 : index
    %c0_56 = arith.constant 0 : index
    %c0_57 = arith.constant 0 : index
    %64 = vector.load %arg4[%c0_54, %c1_55, %c0_56, %c0_57] : memref<1x4x1x256xf32, #tpu.memory_space<vmem>>, vector<1x1x1x256xf32>
    %65 = vector.shape_cast %64 : vector<1x1x1x256xf32> to vector<1x256xf32>
    %66 = vector.broadcast %63 : f32 to vector<1x256xf32>
    %67 = arith.mulf %66, %65 : vector<1x256xf32>
    %68 = arith.addf %62, %67 : vector<1x256xf32>
    %c1_58 = arith.constant 1 : index
    %c2_59 = arith.constant 2 : index
    %69 = memref.load %arg2[%c1_58, %c2_59] : memref<2x8xf32, #tpu.memory_space<smem>>
    %c0_60 = arith.constant 0 : index
    %c2_61 = arith.constant 2 : index
    %c0_62 = arith.constant 0 : index
    %c0_63 = arith.constant 0 : index
    %70 = vector.load %arg4[%c0_60, %c2_61, %c0_62, %c0_63] : memref<1x4x1x256xf32, #tpu.memory_space<vmem>>, vector<1x1x1x256xf32>
    %71 = vector.shape_cast %70 : vector<1x1x1x256xf32> to vector<1x256xf32>
    %72 = vector.broadcast %69 : f32 to vector<1x256xf32>
    %73 = arith.mulf %72, %71 : vector<1x256xf32>
    %74 = arith.addf %68, %73 : vector<1x256xf32>
    %c1_64 = arith.constant 1 : index
    %c3_65 = arith.constant 3 : index
    %75 = memref.load %arg2[%c1_64, %c3_65] : memref<2x8xf32, #tpu.memory_space<smem>>
    %c0_66 = arith.constant 0 : index
    %c3_67 = arith.constant 3 : index
    %c0_68 = arith.constant 0 : index
    %c0_69 = arith.constant 0 : index
    %76 = vector.load %arg4[%c0_66, %c3_67, %c0_68, %c0_69] : memref<1x4x1x256xf32, #tpu.memory_space<vmem>>, vector<1x1x1x256xf32>
    %77 = vector.shape_cast %76 : vector<1x1x1x256xf32> to vector<1x256xf32>
    %78 = vector.broadcast %75 : f32 to vector<1x256xf32>
    %79 = arith.mulf %78, %77 : vector<1x256xf32>
    %80 = arith.addf %74, %79 : vector<1x256xf32>
    %c1_70 = arith.constant 1 : index
    %c4_71 = arith.constant 4 : index
    %81 = memref.load %arg2[%c1_70, %c4_71] : memref<2x8xf32, #tpu.memory_space<smem>>
    %c0_72 = arith.constant 0 : index
    %c0_73 = arith.constant 0 : index
    %c0_74 = arith.constant 0 : index
    %c0_75 = arith.constant 0 : index
    %82 = vector.load %arg5[%c0_72, %c0_73, %c0_74, %c0_75] : memref<1x4x1x256xf32, #tpu.memory_space<vmem>>, vector<1x1x1x256xf32>
    %83 = vector.shape_cast %82 : vector<1x1x1x256xf32> to vector<1x256xf32>
    %84 = vector.broadcast %81 : f32 to vector<1x256xf32>
    %85 = arith.mulf %84, %83 : vector<1x256xf32>
    %86 = arith.addf %80, %85 : vector<1x256xf32>
    %c1_76 = arith.constant 1 : index
    %c5_77 = arith.constant 5 : index
    %87 = memref.load %arg2[%c1_76, %c5_77] : memref<2x8xf32, #tpu.memory_space<smem>>
    %c0_78 = arith.constant 0 : index
    %c1_79 = arith.constant 1 : index
    %c0_80 = arith.constant 0 : index
    %c0_81 = arith.constant 0 : index
    %88 = vector.load %arg5[%c0_78, %c1_79, %c0_80, %c0_81] : memref<1x4x1x256xf32, #tpu.memory_space<vmem>>, vector<1x1x1x256xf32>
    %89 = vector.shape_cast %88 : vector<1x1x1x256xf32> to vector<1x256xf32>
    %90 = vector.broadcast %87 : f32 to vector<1x256xf32>
    %91 = arith.mulf %90, %89 : vector<1x256xf32>
    %92 = arith.addf %86, %91 : vector<1x256xf32>
    %c1_82 = arith.constant 1 : index
    %c6_83 = arith.constant 6 : index
    %93 = memref.load %arg2[%c1_82, %c6_83] : memref<2x8xf32, #tpu.memory_space<smem>>
    %c0_84 = arith.constant 0 : index
    %c2_85 = arith.constant 2 : index
    %c0_86 = arith.constant 0 : index
    %c0_87 = arith.constant 0 : index
    %94 = vector.load %arg5[%c0_84, %c2_85, %c0_86, %c0_87] : memref<1x4x1x256xf32, #tpu.memory_space<vmem>>, vector<1x1x1x256xf32>
    %95 = vector.shape_cast %94 : vector<1x1x1x256xf32> to vector<1x256xf32>
    %96 = vector.broadcast %93 : f32 to vector<1x256xf32>
    %97 = arith.mulf %96, %95 : vector<1x256xf32>
    %98 = arith.addf %92, %97 : vector<1x256xf32>
    %c1_88 = arith.constant 1 : index
    %c7_89 = arith.constant 7 : index
    %99 = memref.load %arg2[%c1_88, %c7_89] : memref<2x8xf32, #tpu.memory_space<smem>>
    %c0_90 = arith.constant 0 : index
    %c3_91 = arith.constant 3 : index
    %c0_92 = arith.constant 0 : index
    %c0_93 = arith.constant 0 : index
    %100 = vector.load %arg5[%c0_90, %c3_91, %c0_92, %c0_93] : memref<1x4x1x256xf32, #tpu.memory_space<vmem>>, vector<1x1x1x256xf32>
    %101 = vector.shape_cast %100 : vector<1x1x1x256xf32> to vector<1x256xf32>
    %102 = vector.broadcast %99 : f32 to vector<1x256xf32>
    %103 = arith.mulf %102, %101 : vector<1x256xf32>
    %104 = arith.addf %98, %103 : vector<1x256xf32>
    %cst_94 = arith.constant 0.000000e+00 : f32
    %105 = vector.broadcast %cst_94 : f32 to vector<1x256xf32>
    %106 = arith.maximumf %104, %105 : vector<1x256xf32>
    %c0_95 = arith.constant 0 : index
    %c1_96 = arith.constant 1 : index
    %c0_97 = arith.constant 0 : index
    %c0_98 = arith.constant 0 : index
    %107 = vector.load %arg6[%c0_95, %c1_96, %c0_97, %c0_98] : memref<1x2x1x256xf32, #tpu.memory_space<vmem>>, vector<1x1x1x256xf32>
    %108 = vector.shape_cast %107 : vector<1x1x1x256xf32> to vector<1x256xf32>
    %109 = vector.shape_cast %106 : vector<1x256xf32> to vector<1x1x1x256xf32>
    tpu.vector_store %arg6[%c0_95, %c1_96, %c0_97, %c0_98], %109 {strides = array<i32>} : memref<1x2x1x256xf32, #tpu.memory_space<vmem>>, vector<1x1x1x256xf32>,
    return
  }
  func.func @transform_0(%arg0: i32, %arg1: i32, %arg2: memref<2x8xf32, #tpu.memory_space<smem>>, %arg3: memref<2xf32, #tpu.memory_space<smem>>) -> (i32, i32, i32, i32) {
    %c0_i32 = arith.constant 0 : i32
    %c0_i32_0 = arith.constant 0 : i32
    %c0_i32_1 = arith.constant 0 : i32
    return %arg0, %c0_i32, %arg1, %c0_i32_0 : i32, i32, i32, i32
  }
  func.func @transform_1(%arg0: i32, %arg1: i32, %arg2: memref<2x8xf32, #tpu.memory_space<smem>>, %arg3: memref<2xf32, #tpu.memory_space<smem>>) -> (i32, i32, i32, i32) {
    %c0_i32 = arith.constant 0 : i32
    %c0_i32_0 = arith.constant 0 : i32
    %c0_i32_1 = arith.constant 0 : i32
    return %arg0, %c0_i32, %arg1, %c0_i32_0 : i32, i32, i32, i32
  }
  func.func @transform_2(%arg0: i32, %arg1: i32, %arg2: memref<2x8xf32, #tpu.memory_space<smem>>, %arg3: memref<2xf32, #tpu.memory_space<smem>>) -> (i32, i32, i32, i32) {
    %c0_i32 = arith.constant 0 : i32
    %c0_i32_0 = arith.constant 0 : i32
    %c0_i32_1 = arith.constant 0 : i32
    return %arg0, %c0_i32, %arg1, %c0_i32_0 : i32, i32, i32, i32
  }
}

</mosaic_0001>

<bundles_post_ra>
// kernel: base_ppm_forward.1
= control target key start
LH: loop header
LB: loop body
LE: loop exit
PB: predicated region body
PF: predicated region fallthrough
CT: control target
= control target key end

     0   :  { %s650_s0 = inlined_call_operand.vmem [shape: f32[2,8], index: 0, kind: input, shape index: {}]   ;;  %s651_s2 = inlined_call_operand.vmem [shape: f32[2,4,1,256], index: 2, kind: input, shape index: {}]   ;;  %s652_s3 = inlined_call_operand.vmem [shape: f32[2,4,1,256], index: 3, kind: input, shape index: {}]   ;;  %s653_s4 = inlined_call_operand.vmem [shape: f32[2,2,1,256], index: 4, kind: output, shape index: {}]   ;;  %s654_s1 = inlined_call_operand.vmem [shape: f32[2], index: 1, kind: input, shape index: {}]  }
   0x1   :  { %s9_s17 = sshll.u32 %s650_s0, 4  ;;  %s13_s20 = sshll.u32 %s654_s1, 4  ;;  %s10_s17 = int_to_ptr.vmem [resolvable:$true] %s9_s17  ;;  %s14_s20 = int_to_ptr.vmem [resolvable:$true] %s13_s20 }
   0x2   :  { %s483_s21 = scalar_lea.vmem %s10_s17, 32  ;;  %p488_p1 = scmp.lt.s32.totalorder %s10_s17, %s10_s17 }
   0x3   :  { %p484_p0 = scmp.ne.s32.totalorder %s10_s17, %s483_s21  ;;  %p489_p2 = scmp.lt.s32.totalorder %s483_s21, %s483_s21 }
   0x5   :  { %p490_p3 = por %p489_p2, %p488_p1 }
   0x7   :  { %p491_p4 = pnand %p490_p3, %p484_p0 }
   0x9   :  { %494 = shalt.err (!%p491_p4)  }
   0xa   :  { %s533_s22 = smov [#allocation3]   ;;  %s495_s23 = scalar_lea.vmem %s14_s20, 16 }
   0xb   :  { %12 = dma.vmem_to_smem %s10_s17, 32, %s533_s22, [#allocation2] }
   0xc   :  { %p496_p5 = scmp.ne.s32.totalorder %s14_s20, %s495_s23  ;;  %p500_p6 = scmp.lt.s32.totalorder %s14_s20, %s14_s20 }
   0xd   :  { %p501_p7 = scmp.lt.s32.totalorder %s495_s23, %s495_s23 }
   0xf   :  { %p502_p8 = por %p501_p7, %p500_p6 }
  0x11   :  { %p503_p9 = pnand %p502_p8, %p496_p5 }
  0x13   :  { %506 = shalt.err (!%p503_p9)  }
  0x14   :  { %s534_s0 = smov [#allocation4]  }
  0x15   :  { %16 = dma.vmem_to_smem %s14_s20, 16, %s534_s0, [#allocation2] }
  0x16   :  { %519 = dma.done.wait [#allocation2], 48 }
  0x17   :  { %520 = vsyncadd [#allocation2], 4294967248 }
  0x18   :  { %18 = sfence }
  0x19   :  { %s566_s1 = smov 0   ;;  %s568_s24 = smov 0  }
  0x1a   :  { %s570_s25 = smov 0  }
  0x1b LB: > { %s36_s26 = sadd.s32 1, %s527_s24  ;;  %p422_p10 = scmp.ge.s32.totalorder %s531_s25, 1  ;;  %s531_s25 = sphi %s570_s25, %s24_s25   ;;  %s527_s24 = sphi %s568_s24, %s656_s24   ;;  %s523_s1 = sphi %s566_s1, %s655_s1  }
  0x1c   : > { %p38_p11 = scmp.ge.s32.totalorder %s36_s26, 2  ;;  %p158_p12 = scmp.lt.s32.totalorder %s531_s25, 3 }
  0x1e   : > { %s658_s26 = smov (%p38_p11, %s36_s26), 0  ;;  %p159_p13 = pnand %p422_p10, %p158_p12 }
  0x1f   : > { %p194_p0 = scmp.lt.s32.totalorder (!%p159_p13), %s523_s1, 1  ;;  %s218_s27 = sld [smem:[#allocation4]] (!%p159_p13)  ;;  %v267_v46 = vlaneseq (!%p159_p13) }
  0x20   : > { %162 = sbr.rel (%p159_p13) target bundleno = 66 (0x42), region = 28  ;;  %s220_s28 = sld [smem:[#allocation3]] (!%p159_p13) }
  0x21   : > { %s426_s29 = sld [smem:[#allocation3 + $0x1]] (!%p159_p13)  ;;  %s428_s30 = sld [smem:[#allocation3 + $0x2]] (!%p159_p13)  ;;  %vm269_vm0 = vcmp.lt.s32.totalorder (!%p159_p13), %v267_v46, 256 }
  0x22   : > { %s430_s5 = sld [smem:[#allocation3 + $0x3]] (!%p159_p13)  ;;  %s432_s13 = sld [smem:[#allocation3 + $0x4]] (!%p159_p13) }
  0x23   : > { %s433_s14 = sld [smem:[#allocation3 + $0x5]] (!%p159_p13)  ;;  %s600_s15 = sld [smem:[#allocation3 + $0x6]] (!%p159_p13) }
  0x24   : > { %s603_s16 = sld [smem:[#allocation3 + $0x7]] (!%p159_p13)  ;;  %s605_s17 = sld [smem:[#allocation4 + $0x1]] (!%p159_p13) }
  0x25   : > { %v219_v2 = vstv (!%p159_p13), %s218_s27  ;;  %s440_s18 = sld [smem:[#allocation3 + $0x80]] (!%p159_p13)  ;;  %s441_s19 = sld [smem:[#allocation3 + $0x81]] (!%p159_p13) }
  0x26   : > { %v222_v3 = vstv (!%p159_p13), %s220_s28  ;;  %s608_s20 = sld [smem:[#allocation3 + $0x82]] (!%p159_p13)  ;;  %s610_s21 = sld [smem:[#allocation3 + $0x83]] (!%p159_p13) }
  0x27   : > { %s660_s1 = smov (!%p194_p0, %s523_s1), 1  ;;  %v228_v4 = vstv %s426_s29  ;;  %v234_v8 = vstv %s428_s30  ;;  %s613_s22 = sld [smem:[#allocation3 + $0x84]] }
  0x28   : > { %s423_s6 = sshll.u32 %s660_s1, 3  ;;  %v240_v10 = vstv %s430_s5  ;;  %v245_v16 = vstv %s432_s13  ;;  %s616_s23 = sld [smem:[#allocation3 + $0x85]] }
  0x29   : > { %s590_s9 = scalar_lea.vmem %s651_s2, %s423_s6  ;;  %s597_s12 = scalar_lea.vmem %s652_s3, %s423_s6  ;;  %v251_v20 = vstv %s433_s14  ;;  %v257_v23 = vstv %s600_s15 }
  0x2a   : > { %v221_v0 = vld [vmem:[%s590_s9] sm:$0x3]  ;;  %v427_v1 = vld [vmem:[%s590_s9 + $0x2] sm:$0x3]  ;;  %v429_v5 = vld [vmem:[%s590_s9 + $0x4] sm:$0x3]  ;;  %v273_v27 = vstv %s605_s17 }
  0x2b   : > { %v223_v6 = vmul.f32 %v222_v3, %v221_v0  ;;  %v229_v7 = vmul.f32 %v427_v1, %v228_v4  ;;  %v431_v9 = vld [vmem:[%s590_s9 + $0x6] sm:$0x3]  ;;  %v235_v12 = vmul.f32 %v429_v5, %v234_v8  ;;  %v244_v13 = vld [vmem:[%s597_s12] sm:$0x3]  ;;  %v434_v17 = vld [vmem:[%s597_s12 + $0x2] sm:$0x3]  ;;  %v276_v28 = vstv %s440_s18 }
  0x2c   : > { %v241_v15 = vmul.f32 %v431_v9, %v240_v10  ;;  %v246_v19 = vmul.f32 %v245_v16, %v244_v13  ;;  %v275_v21 = vld [vmem:[%s590_s9] sm:$0x3]  ;;  %v436_v22 = vld [vmem:[%s597_s12 + $0x4] sm:$0x3]  ;;  %v442_v24 = vld [vmem:[%s590_s9 + $0x2] sm:$0x3]  ;;  %v252_v26 = vmul.f32 %v434_v17, %v251_v20  ;;  %v263_v31 = vstv %s603_s16 }
  0x2d   : > { %v224_v11 = vadd.f32 %v223_v6, %v219_v2  ;;  %v444_v29 = vld [vmem:[%s590_s9 + $0x4] sm:$0x3]  ;;  %s623_s0 = sld [smem:[#allocation3 + $0x86]]  ;;  %v438_v30 = vld [vmem:[%s597_s12 + $0x6] sm:$0x3]  ;;  %v277_v32 = vmul.f32 %v276_v28, %v275_v21  ;;  %v281_v33 = vstv %s441_s19  ;;  %v286_v34 = vstv %s608_s20  ;;  %s452_s27 = sld [smem:[#allocation3 + $0x87]] }
  0x2e   : > { %v258_v36 = vmul.f32 %v436_v22, %v257_v23  ;;  %v282_v37 = vmul.f32 %v442_v24, %v281_v33  ;;  %v446_v38 = vld [vmem:[%s590_s9 + $0x6] sm:$0x3]  ;;  %v291_v39 = vstv %s610_s21  ;;  %v287_v41 = vmul.f32 %v444_v29, %v286_v34  ;;  %v295_v44 = vld [vmem:[%s597_s12] sm:$0x3]  ;;  %s425_s28 = sshll.u32 %s660_s1, 2 }
  0x2f   : > { %v230_v14 = vadd.f32 %v229_v7, %v224_v11  ;;  %v278_v40 = vadd.f32 %v277_v32, %v273_v27  ;;  %v264_v43 = vmul.f32 %v438_v30, %v263_v31  ;;  %v296_v45 = vstv %s613_s22  ;;  %v449_v50 = vld [vmem:[%s597_s12 + $0x2] sm:$0x3]  ;;  %v451_v55 = vld [vmem:[%s597_s12 + $0x4] sm:$0x3]  ;;  %s217_s5 = scalar_lea.vmem %s653_s4, %s425_s28  ;;  %v453_v60 = vld [vmem:[%s597_s12 + $0x6] sm:$0x3] }
  0x30   : > { %v292_v48 = vmul.f32 %v446_v38, %v291_v39  ;;  %v301_v51 = vstv %s616_s23  ;;  %v297_v53 = vmul.f32 %v296_v45, %v295_v44 }
  0x31   : > { %v236_v18 = vadd.f32 %v235_v12, %v230_v14  ;;  %v283_v47 = vadd.f32 %v282_v37, %v278_v40  ;;  %v302_v58 = vmul.f32 %v449_v50, %v301_v51 }
  0x33   : > { %v242_v25 = vadd.f32 %v241_v15, %v236_v18  ;;  %v288_v52 = vadd.f32 %v287_v41, %v283_v47  ;;  %v306_v56 = vstv %s623_s0  ;;  %v311_v61 = vstv %s452_s27 }
  0x34   : > { %v307_v63 = vmul.f32 %v451_v55, %v306_v56  ;;  %v312_v1 = vmul.f32 %v453_v60, %v311_v61 }
  0x35   : > { %v247_v35 = vadd.f32 %v246_v19, %v242_v25  ;;  %v293_v57 = vadd.f32 %v292_v48, %v288_v52 }
  0x37   : > { %v253_v42 = vadd.f32 %v252_v26, %v247_v35  ;;  %v298_v62 = vadd.f32 %v297_v53, %v293_v57 }
  0x39   : > { %v259_v49 = vadd.f32 %v258_v36, %v253_v42  ;;  %v303_v0 = vadd.f32 %v302_v58, %v298_v62 }
  0x3b   : > { %v265_v54 = vadd.f32 %v264_v43, %v259_v49  ;;  %v308_v2 = vadd.f32 %v307_v63, %v303_v0 }
  0x3d   : > { %v266_v59 = vmax.f32 %v265_v54, 0.0  ;;  %v313_v3 = vadd.f32 %v312_v1, %v308_v2 }
  0x3f   : > { %271 = vst.msk [vmem:[%s217_s5] sm:$0x3] %vm269_vm0, %v266_v59  ;;  %v314_v4 = vmax.f32 %v313_v3, 0.0 }
  0x41   : > { %454 = vst.msk [vmem:[%s217_s5 + $0x2] sm:$0x3] %vm269_vm0, %v314_v4 }
  0x42 PF: > { %s24_s25 = sadd.s32 1, %s531_s25   ;;  %s655_s1 = smov %s527_s24 }
  0x43   : > { %p21_p1 = scmp.ge.s32.totalorder %s24_s25, 4   ;;  %s656_s24 = smov %s658_s26 }
  0x45   :  { %23 = sbr.rel (!%p21_p1) target bundleno = 27 (0x1b), region = 68 }

</bundles_post_ra>
